<compile_context>
chip_gen: v7x
topology: tpu7x:2x2x1
jax: 0.10.0
libtpu: 0.0.40
codegen_flags: <defaults>
</compile_context>

<pallas_src>
import numpy as np
import jax
import jax.numpy as jnp
from jax import lax
from jax.experimental import pallas as pl
from jax.experimental.pallas import tpu as pltpu


def _cdiv(a, b):
    return -(-a // b)


def _pick_tile(N, L):
    """Pick the lane tile TR (multiple of 128) and the j-block size JB."""
    # Cap TR so one (L, TR) int32 tile stays <= ~2 MiB (it is double-buffered by
    # the pipeline) and never above 2048 lanes (keeps per-k vreg working set small).
    cap = (2 * 1024 * 1024) // (4 * max(L, 1))
    cap = max(128, min(2048, (cap // 128) * 128))

    best_tr, best_key = 128, None
    for tr in range(128, cap + 1, 128):
        nt = _cdiv(N, tr)
        waste = nt * tr - N
        # Prefer >= 2 tiles when N allows (both TCs on v7x), then minimal padded
        # lanes, then the larger tile (fewer grid steps, bigger DMAs).
        key = (0 if (nt >= 2 or N <= 128) else 1, waste, -tr)
        if best_key is None or key < best_key:
            best_tr, best_key = tr, key
    tr = best_tr

    # j-block: multiple of 8 sublanes, sized so each (JB, TR) intermediate is
    # ~8K elements (a few vregs) -> the dup loop never spills to VMEM.
    jb = max(8, min(64, ((8192 // tr) // 8) * 8))
    jb = min(jb, max(L, 1))
    return tr, jb


def make_diversity_kernel(L, TR, JB, exclude):
    exclude = tuple(int(t) for t in exclude)
    j_starts = tuple(range(0, L, JB))

    def kernel(preds_ref, out_ref):
        # preds_ref: (L, TR) int32, token positions on sublanes, rows on lanes.
        counts = jnp.zeros((1, TR), dtype=jnp.float32)

        for j0 in j_starts:                          # static unroll: cdiv(L, JB) blocks
            jb = min(JB, L - j0)
            p_jb = preds_ref[pl.ds(j0, jb), :]       # (jb, TR) int32
            row_ids = j0 + lax.broadcasted_iota(jnp.int32, (jb, 1), 0)

            dup = jnp.zeros((jb, TR), dtype=jnp.int32)

            # Phase 1: earlier positions strictly below this block.
            # k < j0 <= j for every row in the block -> no triangular mask needed.
            if j0 > 0:
                def body_lo(k, d):
                    pk = preds_ref[pl.ds(k, 1), :]   # (1, TR), sublane-broadcast in compare
                    return jnp.where(p_jb == pk, 1, d)
                dup = lax.fori_loop(0, j0, body_lo, dup, unroll=4)

            # Phase 2: diagonal band k in [j0, j0 + jb), masked with (j > k).
            def body_diag(k, d):
                pk = preds_ref[pl.ds(k, 1), :]       # (1, TR)
                hit = (p_jb == pk) & (row_ids > k)
                return jnp.where(hit, 1, d)
            dup = lax.fori_loop(j0, j0 + jb, body_diag, dup)

            # Excluded tokens (static unroll over the exclude list).
            excl = jnp.zeros((jb, TR), dtype=jnp.bool_)
            for tok in exclude:
                excl = excl | (p_jb == tok)

            keep = jnp.logical_not(excl) & (dup == 0)          # (jb, TR) bool
            counts = counts + jnp.sum(keep.astype(jnp.float32),
                                      axis=0, keepdims=True)

        out_ref[...] = counts                                   # lane-dense (1, TR)

    return kernel


def tensor_diversity1(preds, exclude=()):
    """Pallas implementation of TensorDiversity1.forward. Returns a 0-d f32 array."""
    assert preds.ndim == 2
    N, L = preds.shape
    preds = preds.astype(jnp.int32)

    TR, JB = _pick_tile(N, L)
    num_tiles = _cdiv(N, TR)
    n_pad = num_tiles * TR

    # Rows -> lanes: (N, L) -> (L, N), padded to (L, n_pad). Transpose + pad are
    # a single fused XLA copy; padded lanes are sliced off before the mean.
    pt = preds.T
    if n_pad > N:
        pt = jnp.pad(pt, ((0, 0), (0, n_pad - N)))

    kernel = make_diversity_kernel(L, TR, JB, tuple(exclude))

    counts = pl.pallas_call(
        kernel,
        out_shape=jax.ShapeDtypeStruct((1, n_pad), jnp.float32),
        grid_spec=pltpu.PrefetchScalarGridSpec(
            num_scalar_prefetch=0,
            grid=(num_tiles,),
            in_specs=[pl.BlockSpec((L, TR), lambda i: (0, i))],   # row-batch tile
            out_specs=pl.BlockSpec((1, TR), lambda i: (0, i)),    # per-row counts
        ),
        compiler_params=pltpu.CompilerParams(
            dimension_semantics=("parallel",),
            vmem_limit_bytes=32 * 1024 * 1024,
        ),
    )(pt)

    # Final mean over real rows in plain JAX (padded lanes sliced off).
    score = jnp.sum(counts[0, :N]) / float(L * N)
    return score


if __name__ == "__main__":
    key = jax.random.PRNGKey(0)
    N, L = 16, 8
    exclude = (0, 1)

    preds = jax.random.randint(key, (N, L), 0, 10, dtype=jnp.int32)

    out = tensor_diversity1(preds, exclude=exclude)
    jax.block_until_ready(out)
    score = float(out)

    # Pure-Python reference (mirrors the PyTorch module).
    pn = np.asarray(preds)
    ref = 0.0
    for row in pn:
        toks = [t for t in set(row.tolist()) if t not in exclude]
        ref += len(toks) / L
    ref /= N

    assert abs(score - ref) < 1e-6, (score, ref)
    print("KERNEL_OK")
</pallas_src>

<mosaic_0001>
module attributes {stable_mosaic.version = 11 : i64} {
  func.func @kernel(%arg0: i32, %arg1: memref<8x128xi32, #tpu.memory_space<vmem>>, %arg2: memref<1x128xf32, #tpu.memory_space<vmem>>) attributes {dimension_semantics = [#tpu.dimension_semantics<parallel>], iteration_bounds = array<i64: 1>, scalar_prefetch = 0 : i64, scratch_operands = 0 : i64, tpu.core_type = #tpu.core_type<tc>, window_params = [{transform_indices = @transform_0, window_bounds = array<i64: 8, 128>}, {transform_indices = @transform_1, window_bounds = array<i64: 1, 128>}]} {
    %cst = arith.constant 0.000000e+00 : f32
    %0 = vector.broadcast %cst : f32 to vector<1x128xf32>
    %c0 = arith.constant 0 : index
    %c0_0 = arith.constant 0 : index
    %1 = vector.load %arg1[%c0, %c0_0] : memref<8x128xi32, #tpu.memory_space<vmem>>, vector<8x128xi32>
    %2 = tpu.iota {dimensions = array<i32: 0>} : vector<8x1xi32>
    %c0_i32 = arith.constant 0 : i32
    %3 = vector.broadcast %c0_i32 : i32 to vector<8x1xi32>
    %4 = arith.addi %3, %2 : vector<8x1xi32>
    %c0_i32_1 = arith.constant 0 : i32
    %5 = vector.broadcast %c0_i32_1 : i32 to vector<8x128xi32>
    %c0_i32_2 = arith.constant 0 : i32
    %c8_i32 = arith.constant 8 : i32
    %6 = arith.addi %c0_i32_2, %c8_i32 : i32
    %c1_i32 = arith.constant 1 : i32
    %7 = scf.for %arg3 = %c0_i32_2 to %6 step %c1_i32 iter_args(%arg4 = %5) -> (vector<8x128xi32>)  : i32 {
      %25 = arith.index_cast %arg3 : i32 to index
      %c0_11 = arith.constant 0 : index
      %26 = vector.load %arg1[%25, %c0_11] : memref<8x128xi32, #tpu.memory_space<vmem>>, vector<1x128xi32>
      %27 = vector.broadcast %26 : vector<1x128xi32> to vector<8x128xi32>
      %28 = arith.cmpi eq, %1, %27 : vector<8x128xi32>
      %29 = vector.broadcast %arg3 : i32 to vector<8x1xi32>
      %30 = arith.cmpi sgt, %4, %29 : vector<8x1xi32>
      %31 = vector.broadcast %30 : vector<8x1xi1> to vector<8x128xi1>
      %32 = arith.andi %28, %31 : vector<8x128xi1>
      %c1_i32_12 = arith.constant 1 : i32
      %33 = vector.broadcast %c1_i32_12 : i32 to vector<8x128xi32>
      %34 = arith.select %32, %33, %arg4 : vector<8x128xi1>, vector<8x128xi32>
      scf.yield %34 : vector<8x128xi32>
    }
    %c8_i32_3 = arith.constant 8 : i32
    %false = arith.constant false
    %8 = vector.broadcast %false : i1 to vector<8x128xi1>
    %c0_i32_4 = arith.constant 0 : i32
    %9 = vector.broadcast %c0_i32_4 : i32 to vector<8x128xi32>
    %10 = arith.cmpi eq, %1, %9 : vector<8x128xi32>
    %11 = arith.ori %8, %10 : vector<8x128xi1>
    %c1_i32_5 = arith.constant 1 : i32
    %12 = vector.broadcast %c1_i32_5 : i32 to vector<8x128xi32>
    %13 = arith.cmpi eq, %1, %12 : vector<8x128xi32>
    %14 = arith.ori %11, %13 : vector<8x128xi1>
    %cst_6 = arith.constant dense<true> : vector<8x128xi1>
    %15 = arith.xori %14, %cst_6 : vector<8x128xi1>
    %c0_i32_7 = arith.constant 0 : i32
    %16 = vector.broadcast %c0_i32_7 : i32 to vector<8x128xi32>
    %17 = arith.cmpi eq, %7, %16 : vector<8x128xi32>
    %18 = arith.andi %15, %17 : vector<8x128xi1>
    %19 = arith.extui %18 : vector<8x128xi1> to vector<8x128xi32>
    %20 = arith.sitofp %19 : vector<8x128xi32> to vector<8x128xf32>
    %cst_8 = arith.constant dense<0.000000e+00> : vector<128xf32>
    %21 = vector.multi_reduction <add>, %20, %cst_8 [0] : vector<8x128xf32> to vector<128xf32>
    %22 = vector.shape_cast %21 : vector<128xf32> to vector<1x128xf32>
    %23 = arith.addf %0, %22 : vector<1x128xf32>
    %c0_9 = arith.constant 0 : index
    %c0_10 = arith.constant 0 : index
    %24 = vector.load %arg2[%c0_9, %c0_10] : memref<1x128xf32, #tpu.memory_space<vmem>>, vector<1x128xf32>
    tpu.vector_store %arg2[%c0_9, %c0_10], %23 {strides = array<i32>} : memref<1x128xf32, #tpu.memory_space<vmem>>, vector<1x128xf32>,
    return
  }
  func.func @transform_0(%arg0: i32) -> (i32, i32) {
    %c0_i32 = arith.constant 0 : i32
    %c0_i32_0 = arith.constant 0 : i32
    return %c0_i32, %arg0 : i32, i32
  }
  func.func @transform_1(%arg0: i32) -> (i32, i32) {
    %c0_i32 = arith.constant 0 : i32
    %c0_i32_0 = arith.constant 0 : i32
    return %c0_i32, %arg0 : i32, i32
  }
}

</mosaic_0001>

<bundles_post_ra>
// kernel: tpu_custom_call.1
= control target key start
LH: loop header
LB: loop body
LE: loop exit
PB: predicated region body
PF: predicated region fallthrough
CT: control target
= control target key end

     0   :  { %6 = vsyncpa [#allocation3], 0  ;;  %s208_s0 = inlined_call_operand.hbm [shape: s32[8,128], index: 0, kind: input, shape index: {}]   ;;  %s209_s1 = inlined_call_operand.hbm [shape: f32[1,128], index: 1, kind: output, shape index: {}]  }
   0x1   :  { %7 = vsyncpa [#allocation4], 0  ;;  %s170_s6 = smov [#allocation2]   ;;  %s106_s10 = scalar_lea.hbm %s208_s0, 128 }
   0x2   :  { %s14_s7 = sshll.u32 %s170_s6, 4  ;;  %p107_p0 = scmp.ne.s32.totalorder %s208_s0, %s106_s10  ;;  %s15_s7 = int_to_ptr.vmem [resolvable:$true] %s14_s7 }
   0x3   :  { %p110_p1 = scmp.lt.u32.totalorder %s106_s10, %s208_s0 }
   0x5   :  { %p112_p2 = pnand %p110_p1, %p107_p0 }
   0x7   :  { %115 = shalt.err (!%p112_p2)
}
   0x8   :  { %s116_s15 = scalar_lea.vmem %s15_s7, 128  ;;  %p121_p4 = scmp.lt.s32.totalorder %s15_s7, %s15_s7 }
   0x9   :  { %p117_p3 = scmp.ne.s32.totalorder %s15_s7, %s116_s15  ;;  %p122_p5 = scmp.lt.s32.totalorder %s116_s15, %s116_s15 }
   0xb   :  { %p123_p6 = por %p122_p5, %p121_p4 }
   0xd   :  { %p124_p7 = pnand %p123_p6, %p117_p3 }
   0xf   :  { %127 = shalt.err (!%p124_p7)
}
  0x10   :  { %17 = dma.hbm_to_vmem [thread:$0]  %s208_s0, 128, %s15_s7, [#allocation3]  }
  0x11   :  { %158 = dma.done.wait [#allocation3], 128  }
  0x12   :  { %159 = vsyncadd [#allocation3], 4294967168  ;;  %v22_v0 = vlaneseq  ;;  %v21_v2 = vld [vmem:[#allocation2] sm:$0xff]  ;;  %v162_v3 = vmov 0   ;;  %s166_s18 = smov 0  }
  0x14   :  { %v23_v1 = vshrl.u32 %v22_v0, 7 }
  0x15 LB: > { %v38_v4 = vstv %s168_s18  ;;  %s31_s19 = scalar_lea.vmem [#allocation2], %s168_s18  ;;  %s29_s18 = sadd.s32 1, %s168_s18   ;;  %s168_s18 = sphi %s166_s18, %s29_s18   ;;  %v164_v3 = vphi %v162_v3, %v163_v3  }
  0x16   : > { %v84_v5 = vld [vmem:[%s31_s19] ss:$0 sm:$0xff]  ;;  %vm39_vm0 = vcmp.gt.s32.totalorder %v23_v1, %v38_v4  ;;  %p26_p8 = scmp.ge.s32.totalorder %s29_s18, 8  }
  0x17   : > { %vm37_vm1 = vcmp.eq.s32.totalorder %v21_v2, %v84_v5  ;;  %vm44_vm3 = vcmp.eq.s32.totalorder (%p26_p8), %v21_v2, 0  ;;  %vm45_vm4 = vcmp.eq.s32.totalorder (%p26_p8), %v21_v2, 1  ;;  %vm171_vm7 = vmmov (%p26_p8), 1   ;;  %s173_s0 = smov (%p26_p8), [#allocation5]  }
  0x18   : > { %vm42_vm2 = vmand %vm37_vm1, %vm39_vm0  ;;  %28 = sbr.rel (!%p26_p8) target bundleno = 21 (0x15), region = 36  ;;  %v172_v7 = vmov (%p26_p8), 0.0   ;;  %s66_s20 = sshll.u32 (%p26_p8), %s173_s0, 4  ;;  %s67_s20 = int_to_ptr.vmem [resolvable:$true] %s66_s20 }
  0x19   : > { %v43_v6 = vsel %vm42_vm2, 1, %v164_v3   ;;  %vm46_vm6 = vmor (%p26_p8), %vm44_vm3, %vm45_vm4  ;;  %s128_s21 = scalar_lea.vmem (%p26_p8), %s67_s20, 16  ;;  %s132_s22 = scalar_lea.vmem (%p26_p8), %s67_s20, 32 }
  0x1a   : > { %v163_v3 = vmov %v43_v6   ;;  %vm48_vm5 = vcmp.eq.s32.totalorder (%p26_p8), %v43_v6, 0  ;;  %vm47_vm8 = vmxor (%p26_p8), %vm46_vm6, %vm171_vm7  ;;  %p129_p9 = scmp.ne.s32.totalorder (%p26_p8), %s67_s20, %s128_s21  ;;  %p133_p10 = scmp.lt.s32.totalorder (%p26_p8), %s67_s20, %s67_s20 }
  0x1b   :  { %vm49_vm9 = vmand (%p26_p8), %vm47_vm8, %vm48_vm5  ;;  %p134_p11 = scmp.lt.s32.totalorder (%p26_p8), %s132_s22, %s128_s21 }
  0x1c   :  { %v85_v8 = vsel (%p26_p8), %vm49_vm9, 1.0, %v172_v7 }
  0x1d   :  { %v52_v9 = vrot.slane (%p26_p8), %v85_v8, 4  ;;  %p135_p12 = por (%p26_p8), %p134_p11, %p133_p10 }
  0x1f   :  { %v53_v10 = vadd.f32 %v85_v8, %v52_v9  ;;  %p136_p13 = pnand %p135_p12, %p129_p9 }
  0x21   :  { %v54_v11 = vrot.slane %v53_v10, 2 }
  0x23   :  { %v55_v12 = vadd.f32 %v54_v11, %v53_v10 }
  0x25   :  { %v56_v13 = vrot.slane %v55_v12, 1 }
  0x27   :  { %v57_v14 = vadd.f32 %v56_v13, %v55_v12 }
  0x29   :  { %59 = vst [vmem:[#allocation5] sm:$0x1] %v57_v14 }
  0x2a   :  { %139 = shalt.err (!%p136_p13)
}
  0x2b   :  { %s140_s25 = scalar_lea.hbm %s209_s1, 16 }
  0x2c   :  { %p141_p0 = scmp.ne.s32.totalorder %s209_s1, %s140_s25  ;;  %p144_p1 = scmp.lt.u32.totalorder %s140_s25, %s209_s1 }
  0x2e   :  { %p146_p2 = pnand %p144_p1, %p141_p0 }
  0x30   :  { %149 = shalt.err (!%p146_p2)
}
  0x31   :  { %69 = dma.vmem_to_hbm [thread:$0]  %s67_s20, 16, %s209_s1, [#allocation4]  }
  0x32   :  { %160 = dma.done.wait [#allocation4], 16  }
  0x33   :  { %161 = vsyncadd [#allocation4], 4294967280 }
  0x34   :  { %73 = vsyncpa [#allocation3], 1 }
  0x35   :  { %74 = vsyncpa [#allocation4], 1 }

</bundles_post_ra>
